<compile_context>
chip_gen: v7x
topology: tpu7x:2x2x1
jax: 0.10.0
libtpu: 0.0.40
codegen_flags: <defaults>
</compile_context>

<pallas_src>
import functools

import jax
import jax.numpy as jnp
from jax import lax
from jax.experimental import pallas as pl
from jax.experimental.pallas import tpu as pltpu

LANES = 128      # hidden width padded to one lane-dense tile
OUT_W = 8        # narrow output slab: lane 0 = p0, lane 1 = p1, rest filler
SUBLANES = 8


def _round_up(n, m):
    return ((n + m - 1) // m) * m


def _has_bf16_vpu():
    """v6e / v7x have bf16 VALUs; v2-v5 do not (keep the f32 epilogue there)."""
    try:
        kind = jax.devices()[0].device_kind.lower()
    except Exception:
        return True
    return not any(t in kind for t in ("v2", "v3", "v4", "v5"))


def _default_batch_tile(B):
    if B <= 64:
        return _round_up(B, SUBLANES)
    # Aim for >=4 grid steps so the "parallel" axis keeps both v7x TensorCores
    # busy; cap at 2048 rows (amortizes per-step overhead on single-TC chips,
    # VMEM footprint per step stays well under 2 MiB).
    tb = _round_up(pl.cdiv(B, 4), SUBLANES)
    return max(SUBLANES * 8, min(tb, 2048))


def _mlp_kernel(x_ref, w1_ref, b1_ref, w2_ref, b2_ref, w3_ref, w4d_ref, o_ref,
                *, bf16_epilogue):
    # Cast the input tile to bf16 on the VPU (avoids a separate wrapper-side
    # HBM pass that would materialize a bf16/padded copy of x).
    x = x_ref[...].astype(jnp.bfloat16)

    def linear_relu(h, w_ref, b_ref):
        acc = jnp.dot(h, w_ref[...], preferred_element_type=jnp.float32)
        if bf16_epilogue:
            # bf16 bias-add + ReLU (v6e/v7x bf16 VALUs): halves VALU work and
            # intermediate vreg footprint; output is bf16, ready for the MXU.
            hb = acc.astype(jnp.bfloat16)
            if b_ref is not None:
                hb = hb + b_ref[...]
            return jnp.maximum(hb, 0.0)
        # f32 epilogue (v5e: no bf16 VPU), then cast down for the next matmul.
        if b_ref is not None:
            acc = acc + b_ref[...].astype(jnp.float32)
        return jnp.maximum(acc, 0.0).astype(jnp.bfloat16)

    h = linear_relu(x, w1_ref, b1_ref)      # fc1 + relu
    h = linear_relu(h, w2_ref, b2_ref)      # fc2 + relu  (dropout = identity, eval)
    h = linear_relu(h, w3_ref, None)        # fc3 (no bias) + relu

    # fc4 folded into the logit-difference column d = h @ (w4[:,0] - w4[:,1]),
    # replicated over only OUT_W lanes (narrow output slab).
    d = jnp.dot(h, w4d_ref[...], preferred_element_type=jnp.float32)  # (tb, OUT_W)

    # 2-class softmax == sigmoid of the logit difference.  exp -> EUP,
    # approx reciprocal -> EUP (no VPU Newton refinement), no XLU reductions.
    p0 = pl.reciprocal(1.0 + jnp.exp(-d), approx=True)
    lane = lax.broadcasted_iota(jnp.int32, p0.shape, dimension=1)
    o_ref[...] = jnp.where(lane == 1, 1.0 - p0, p0)


def model_bilinear_forward(x, kparams, *, batch_tile=None, bf16_epilogue=None):
    """x: (B, D_in) float32.  kparams: output of prep_params()."""
    B, D_in = x.shape
    Fp = kparams["w1"].shape[1]  # hidden width, already padded to 128
    if bf16_epilogue is None:
        bf16_epilogue = _has_bf16_vpu()

    tb = batch_tile or _default_batch_tile(B)
    tb = _round_up(tb, SUBLANES)
    grid = (pl.cdiv(B, tb),)
    # NOTE: the final (possibly partial) block may read padded input rows;
    # that is safe because the corresponding output rows are clipped on store.

    kernel = functools.partial(_mlp_kernel, bf16_epilogue=bf16_epilogue)

    out = pl.pallas_call(
        kernel,
        out_shape=jax.ShapeDtypeStruct((B, OUT_W), jnp.float32),
        grid_spec=pltpu.PrefetchScalarGridSpec(
            num_scalar_prefetch=0,
            grid=grid,
            in_specs=[
                pl.BlockSpec((tb, D_in), lambda i: (i, 0)),    # x tile (only per-step DMA)
                pl.BlockSpec((D_in, Fp), lambda i: (0, 0)),    # W1 (constant index -> resident)
                pl.BlockSpec((1, Fp), lambda i: (0, 0)),       # b1
                pl.BlockSpec((Fp, Fp), lambda i: (0, 0)),      # W2
                pl.BlockSpec((1, Fp), lambda i: (0, 0)),       # b2
                pl.BlockSpec((Fp, Fp), lambda i: (0, 0)),      # W3
                pl.BlockSpec((Fp, OUT_W), lambda i: (0, 0)),   # folded fc4 diff column
            ],
            out_specs=pl.BlockSpec((tb, OUT_W), lambda i: (i, 0)),
        ),
        compiler_params=pltpu.CompilerParams(
            dimension_semantics=("parallel",),
            # Footprint per step is < 2 MiB; explicit limit documents headroom
            # and is safe on v5e/v6e (128 MiB) and v7x (64 MiB physical).
            vmem_limit_bytes=32 * 1024 * 1024,
        ),
    )(x, kparams["w1"], kparams["b1"], kparams["w2"], kparams["b2"],
      kparams["w3"], kparams["w4d"])

    return out[:, :2]


def init_raw_params(key, d_in, features):
    """PyTorch-style init: uniform(-1/sqrt(fan_in), +). Weights stored as (in, out)."""
    ks = jax.random.split(key, 6)

    def u(k, shape, fan_in):
        bound = 1.0 / jnp.sqrt(jnp.float32(fan_in))
        return jax.random.uniform(k, shape, jnp.float32, -bound, bound)

    return {
        "w1": u(ks[0], (d_in, features), d_in),
        "b1": u(ks[1], (features,), d_in),
        "w2": u(ks[2], (features, features), features),
        "b2": u(ks[3], (features,), features),
        "w3": u(ks[4], (features, features), features),
        "w4": u(ks[5], (features, 2), features),
    }


def prep_params(raw):
    """Pad hidden width to 128 lanes, cast to bf16, fold fc4 into a diff column."""
    d_in, f = raw["w1"].shape
    fp = _round_up(f, LANES)

    def pad_cols(w):
        return jnp.pad(w, ((0, 0), (0, fp - w.shape[1])))

    def pad_both(w):
        return jnp.pad(w, ((0, fp - w.shape[0]), (0, fp - w.shape[1])))

    # fc4 folded into a single difference column, replicated over OUT_W lanes.
    w4_diff = raw["w4"][:, 0] - raw["w4"][:, 1]                         # (f,)
    w4d = jnp.broadcast_to(jnp.pad(w4_diff, (0, fp - f))[:, None], (fp, OUT_W))

    return {
        "w1": pad_cols(raw["w1"]).astype(jnp.bfloat16),
        "b1": jnp.pad(raw["b1"], (0, fp - f)).reshape(1, fp).astype(jnp.bfloat16),
        "w2": pad_both(raw["w2"]).astype(jnp.bfloat16),
        "b2": jnp.pad(raw["b2"], (0, fp - f)).reshape(1, fp).astype(jnp.bfloat16),
        "w3": pad_both(raw["w3"]).astype(jnp.bfloat16),
        "w4d": w4d.astype(jnp.bfloat16),
    }


def kernel_reference(x, kp, *, bf16_epilogue):
    """Pure-JAX replica of the kernel's algebra (bf16 matmuls, folded fc4)."""

    def linear_relu(h, w, b):
        acc = jnp.dot(h, w, preferred_element_type=jnp.float32)
        if bf16_epilogue:
            hb = acc.astype(jnp.bfloat16)
            if b is not None:
                hb = hb + b
            return jnp.maximum(hb, 0.0)
        if b is not None:
            acc = acc + b.astype(jnp.float32)
        return jnp.maximum(acc, 0.0).astype(jnp.bfloat16)

    h = x.astype(jnp.bfloat16)
    h = linear_relu(h, kp["w1"], kp["b1"])
    h = linear_relu(h, kp["w2"], kp["b2"])
    h = linear_relu(h, kp["w3"], None)
    d = jnp.dot(h, kp["w4d"][:, :1], preferred_element_type=jnp.float32)  # (B, 1)
    p0 = 1.0 / (1.0 + jnp.exp(-d))
    return jnp.concatenate([p0, 1.0 - p0], axis=1)


def torch_reference(x, raw):
    """Original f32 module semantics (eval mode)."""
    h = jax.nn.relu(x @ raw["w1"] + raw["b1"])
    h = jax.nn.relu(h @ raw["w2"] + raw["b2"])
    h = jax.nn.relu(h @ raw["w3"])
    logits = h @ raw["w4"]
    return jax.nn.softmax(logits, axis=1)


if __name__ == "__main__":
    key = jax.random.PRNGKey(0)
    k_x, k_p = jax.random.split(key)

    B, D_IN, FEATURES = 8, 16, 32

    x = jax.random.normal(k_x, (B, D_IN), dtype=jnp.float32)
    raw = init_raw_params(k_p, D_IN, FEATURES)
    kparams = prep_params(raw)

    bf16_epi = _has_bf16_vpu()
    out = model_bilinear_forward(x, kparams, bf16_epilogue=bf16_epi)
    out = jax.block_until_ready(out)
    assert out.shape == (B, 2)

    # Tight check: same bf16/folded algebra in plain JAX (approx reciprocal in
    # the kernel -> modest tolerance).
    ref_tight = kernel_reference(x, kparams, bf16_epilogue=bf16_epi)
    assert jnp.allclose(out, ref_tight, atol=1e-2, rtol=1e-2), (
        float(jnp.max(jnp.abs(out - ref_tight))))

    # Loose check: original full-precision module semantics.
    ref_loose = torch_reference(x, raw)
    assert jnp.allclose(out, ref_loose, atol=5e-2), (
        float(jnp.max(jnp.abs(out - ref_loose))))

    # Probabilities sum to 1 (p1 computed as 1 - p0, so exact to f32 rounding).
    assert jnp.allclose(jnp.sum(out, axis=1), 1.0, atol=1e-5)

    print("KERNEL_OK")
</pallas_src>

<mosaic_0001>
module attributes {stable_mosaic.version = 11 : i64} {
  func.func @_mlp_kernel(%arg0: i32, %arg1: memref<8x16xf32, #tpu.memory_space<vmem>>, %arg2: memref<16x128xbf16, #tpu.memory_space<vmem>>, %arg3: memref<1x128xbf16, #tpu.memory_space<vmem>>, %arg4: memref<128x128xbf16, #tpu.memory_space<vmem>>, %arg5: memref<1x128xbf16, #tpu.memory_space<vmem>>, %arg6: memref<128x128xbf16, #tpu.memory_space<vmem>>, %arg7: memref<128x8xbf16, #tpu.memory_space<vmem>>, %arg8: memref<8x8xf32, #tpu.memory_space<vmem>>) attributes {dimension_semantics = [#tpu.dimension_semantics<parallel>], iteration_bounds = array<i64: 1>, scalar_prefetch = 0 : i64, scratch_operands = 0 : i64, tpu.core_type = #tpu.core_type<tc>, window_params = [{transform_indices = @transform_0, window_bounds = array<i64: 8, 16>}, {pipeline_mode = #tpu.pipeline_mode<synchronous>, transform_indices = @transform_1, window_bounds = array<i64: 16, 128>}, {pipeline_mode = #tpu.pipeline_mode<synchronous>, transform_indices = @transform_2, window_bounds = array<i64: 1, 128>}, {pipeline_mode = #tpu.pipeline_mode<synchronous>, transform_indices = @transform_3, window_bounds = array<i64: 128, 128>}, {pipeline_mode = #tpu.pipeline_mode<synchronous>, transform_indices = @transform_4, window_bounds = array<i64: 1, 128>}, {pipeline_mode = #tpu.pipeline_mode<synchronous>, transform_indices = @transform_5, window_bounds = array<i64: 128, 128>}, {pipeline_mode = #tpu.pipeline_mode<synchronous>, transform_indices = @transform_6, window_bounds = array<i64: 128, 8>}, {transform_indices = @transform_7, window_bounds = array<i64: 8, 8>}]} {
    %c0 = arith.constant 0 : index
    %c0_0 = arith.constant 0 : index
    %0 = vector.load %arg1[%c0, %c0_0] : memref<8x16xf32, #tpu.memory_space<vmem>>, vector<8x16xf32>
    %1 = arith.truncf %0 : vector<8x16xf32> to vector<8x16xbf16>
    %c0_1 = arith.constant 0 : index
    %c0_2 = arith.constant 0 : index
    %2 = vector.load %arg2[%c0_1, %c0_2] : memref<16x128xbf16, #tpu.memory_space<vmem>>, vector<16x128xbf16>
    %cst = arith.constant dense<0.000000e+00> : vector<8x128xf32>
    %3 = tpu.matmul %1, %2, %cst {dimension_numbers = #tpu.dot_dimension_numbers<[1], [0], [0], [1], [0, 0, 1, 1], [], []>} : vector<8x16xbf16>, vector<16x128xbf16>, vector<8x128xf32> -> vector<8x128xf32>
    %4 = arith.truncf %3 : vector<8x128xf32> to vector<8x128xbf16>
    %c0_3 = arith.constant 0 : index
    %c0_4 = arith.constant 0 : index
    %5 = vector.load %arg3[%c0_3, %c0_4] : memref<1x128xbf16, #tpu.memory_space<vmem>>, vector<1x128xbf16>
    %6 = vector.broadcast %5 : vector<1x128xbf16> to vector<8x128xbf16>
    %7 = arith.addf %4, %6 : vector<8x128xbf16>
    %cst_5 = arith.constant 0.000000e+00 : bf16
    %8 = vector.broadcast %cst_5 : bf16 to vector<8x128xbf16>
    %9 = arith.maximumf %7, %8 : vector<8x128xbf16>
    %c0_6 = arith.constant 0 : index
    %c0_7 = arith.constant 0 : index
    %10 = vector.load %arg4[%c0_6, %c0_7] : memref<128x128xbf16, #tpu.memory_space<vmem>>, vector<128x128xbf16>
    %cst_8 = arith.constant dense<0.000000e+00> : vector<8x128xf32>
    %11 = tpu.matmul %9, %10, %cst_8 {dimension_numbers = #tpu.dot_dimension_numbers<[1], [0], [0], [1], [0, 0, 1, 1], [], []>} : vector<8x128xbf16>, vector<128x128xbf16>, vector<8x128xf32> -> vector<8x128xf32>
    %12 = arith.truncf %11 : vector<8x128xf32> to vector<8x128xbf16>
    %c0_9 = arith.constant 0 : index
    %c0_10 = arith.constant 0 : index
    %13 = vector.load %arg5[%c0_9, %c0_10] : memref<1x128xbf16, #tpu.memory_space<vmem>>, vector<1x128xbf16>
    %14 = vector.broadcast %13 : vector<1x128xbf16> to vector<8x128xbf16>
    %15 = arith.addf %12, %14 : vector<8x128xbf16>
    %cst_11 = arith.constant 0.000000e+00 : bf16
    %16 = vector.broadcast %cst_11 : bf16 to vector<8x128xbf16>
    %17 = arith.maximumf %15, %16 : vector<8x128xbf16>
    %c0_12 = arith.constant 0 : index
    %c0_13 = arith.constant 0 : index
    %18 = vector.load %arg6[%c0_12, %c0_13] : memref<128x128xbf16, #tpu.memory_space<vmem>>, vector<128x128xbf16>
    %cst_14 = arith.constant dense<0.000000e+00> : vector<8x128xf32>
    %19 = tpu.matmul %17, %18, %cst_14 {dimension_numbers = #tpu.dot_dimension_numbers<[1], [0], [0], [1], [0, 0, 1, 1], [], []>} : vector<8x128xbf16>, vector<128x128xbf16>, vector<8x128xf32> -> vector<8x128xf32>
    %20 = arith.truncf %19 : vector<8x128xf32> to vector<8x128xbf16>
    %cst_15 = arith.constant 0.000000e+00 : bf16
    %21 = vector.broadcast %cst_15 : bf16 to vector<8x128xbf16>
    %22 = arith.maximumf %20, %21 : vector<8x128xbf16>
    %c0_16 = arith.constant 0 : index
    %c0_17 = arith.constant 0 : index
    %23 = vector.load %arg7[%c0_16, %c0_17] : memref<128x8xbf16, #tpu.memory_space<vmem>>, vector<128x8xbf16>
    %cst_18 = arith.constant dense<0.000000e+00> : vector<8x8xf32>
    %24 = tpu.matmul %22, %23, %cst_18 {dimension_numbers = #tpu.dot_dimension_numbers<[1], [0], [0], [1], [0, 0, 1, 1], [], []>} : vector<8x128xbf16>, vector<128x8xbf16>, vector<8x8xf32> -> vector<8x8xf32>
    %cst_19 = arith.constant 0.000000e+00 : f32
    %25 = vector.broadcast %cst_19 : f32 to vector<8x8xf32>
    %26 = arith.subf %25, %24 : vector<8x8xf32>
    %27 = math.exp %26 : vector<8x8xf32>
    %cst_20 = arith.constant 1.000000e+00 : f32
    %28 = vector.broadcast %cst_20 : f32 to vector<8x8xf32>
    %29 = arith.addf %28, %27 : vector<8x8xf32>
    %30 = tpu.reciprocal %29 {approx = true} : vector<8x8xf32> -> vector<8x8xf32>
    %31 = tpu.iota {dimensions = array<i32: 1>} : vector<8x8xi32>
    %c1_i32 = arith.constant 1 : i32
    %32 = vector.broadcast %c1_i32 : i32 to vector<8x8xi32>
    %33 = arith.cmpi eq, %31, %32 : vector<8x8xi32>
    %cst_21 = arith.constant 1.000000e+00 : f32
    %34 = vector.broadcast %cst_21 : f32 to vector<8x8xf32>
    %35 = arith.subf %34, %30 : vector<8x8xf32>
    %36 = arith.select %33, %35, %30 : vector<8x8xi1>, vector<8x8xf32>
    %c0_22 = arith.constant 0 : index
    %c0_23 = arith.constant 0 : index
    %37 = vector.load %arg8[%c0_22, %c0_23] : memref<8x8xf32, #tpu.memory_space<vmem>>, vector<8x8xf32>
    tpu.vector_store %arg8[%c0_22, %c0_23], %36 {strides = array<i32>} : memref<8x8xf32, #tpu.memory_space<vmem>>, vector<8x8xf32>,
    return
  }
  func.func @transform_0(%arg0: i32) -> (i32, i32) {
    %c0_i32 = arith.constant 0 : i32
    %c0_i32_0 = arith.constant 0 : i32
    return %arg0, %c0_i32 : i32, i32
  }
  func.func @transform_1(%arg0: i32) -> (i32, i32) {
    %c0_i32 = arith.constant 0 : i32
    %c0_i32_0 = arith.constant 0 : i32
    %c0_i32_1 = arith.constant 0 : i32
    return %c0_i32, %c0_i32_0 : i32, i32
  }
  func.func @transform_2(%arg0: i32) -> (i32, i32) {
    %c0_i32 = arith.constant 0 : i32
    %c0_i32_0 = arith.constant 0 : i32
    %c0_i32_1 = arith.constant 0 : i32
    return %c0_i32, %c0_i32_0 : i32, i32
  }
  func.func @transform_3(%arg0: i32) -> (i32, i32) {
    %c0_i32 = arith.constant 0 : i32
    %c0_i32_0 = arith.constant 0 : i32
    %c0_i32_1 = arith.constant 0 : i32
    return %c0_i32, %c0_i32_0 : i32, i32
  }
  func.func @transform_4(%arg0: i32) -> (i32, i32) {
    %c0_i32 = arith.constant 0 : i32
    %c0_i32_0 = arith.constant 0 : i32
    %c0_i32_1 = arith.constant 0 : i32
    return %c0_i32, %c0_i32_0 : i32, i32
  }
  func.func @transform_5(%arg0: i32) -> (i32, i32) {
    %c0_i32 = arith.constant 0 : i32
    %c0_i32_0 = arith.constant 0 : i32
    %c0_i32_1 = arith.constant 0 : i32
    return %c0_i32, %c0_i32_0 : i32, i32
  }
  func.func @transform_6(%arg0: i32) -> (i32, i32) {
    %c0_i32 = arith.constant 0 : i32
    %c0_i32_0 = arith.constant 0 : i32
    %c0_i32_1 = arith.constant 0 : i32
    return %c0_i32, %c0_i32_0 : i32, i32
  }
  func.func @transform_7(%arg0: i32) -> (i32, i32) {
    %c0_i32 = arith.constant 0 : i32
    %c0_i32_0 = arith.constant 0 : i32
    return %arg0, %c0_i32 : i32, i32
  }
}

</mosaic_0001>

<bundles_post_ra>
// kernel: tpu_custom_call.1
= control target key start
LH: loop header
LB: loop body
LE: loop exit
PB: predicated region body
PF: predicated region fallthrough
CT: control target
= control target key end

     0   :  { %12 = vsyncpa [#allocation3], 0  ;;  %s880_s0 = inlined_call_operand.vmem [shape: f32[8,16], index: 0, kind: input, shape index: {}]   ;;  %s881_s1 = inlined_call_operand.hbm [shape: bf16[16,128], index: 1, kind: input, shape index: {}]   ;;  %s882_s2 = inlined_call_operand.vmem [shape: bf16[1,128], index: 2, kind: input, shape index: {}]   ;;  %s883_s3 = inlined_call_operand.vmem [shape: bf16[128,128], index: 3, kind: input, shape index: {}]   ;;  %s884_s4 = inlined_call_operand.vmem [shape: bf16[1,128], index: 4, kind: input, shape index: {}]   ;;  %s885_s5 = inlined_call_operand.hbm [shape: bf16[128,128], index: 5, kind: input, shape index: {}]   ;;  %s886_s6 = inlined_call_operand.vmem [shape: bf16[128,8], index: 6, kind: input, shape index: {}]   ;;  %s887_s7 = inlined_call_operand.hbm [shape: f32[8,8], index: 7, kind: output, shape index: {}]  }
   0x1   :  { %13 = vsyncpa [#allocation6], 0 }
   0x2   :  { %14 = vsyncpa [#allocation4], 0  ;;  %s704_s24 = smov [#allocation2]   ;;  %s632_s28 = scalar_lea.hbm %s881_s1, 128 }
   0x3   :  { %s22_s25 = sshll.u32 %s704_s24, 4  ;;  %p633_p0 = scmp.ne.s32.totalorder %s881_s1, %s632_s28  ;;  %s23_s25 = int_to_ptr.vmem [resolvable:$true] %s22_s25 }
   0x4   :  { %p636_p1 = scmp.lt.u32.totalorder %s632_s28, %s881_s1 }
   0x6   :  { %p638_p2 = pnand %p636_p1, %p633_p0 }
   0x8   :  { %641 = shalt.err (!%p638_p2)
}
   0x9   :  { %s642_s10 = scalar_lea.vmem %s23_s25, 128  ;;  %p647_p4 = scmp.lt.s32.totalorder %s23_s25, %s23_s25 }
   0xa   :  { %p643_p3 = scmp.ne.s32.totalorder %s23_s25, %s642_s10  ;;  %p648_p5 = scmp.lt.s32.totalorder %s642_s10, %s642_s10 }
   0xc   :  { %p649_p6 = por %p648_p5, %p647_p4 }
   0xe   :  { %p650_p7 = pnand %p649_p6, %p643_p3 }
  0x10   :  { %653 = shalt.err (!%p650_p7)
}
  0x11   :  { %s705_s11 = smov 64   ;;  %s706_s12 = smov 4  }
  0x12   :  { %28 = dma.hbm_to_vmem [thread:$0]  %s881_s1, 128, %s23_s25, [#allocation3], %s705_s11, %s705_s11, %s706_s12  }
  0x13   :  { %s707_s15 = smov [#allocation5]   ;;  %s654_s19 = scalar_lea.hbm %s885_s5, 1024 }
  0x14   :  { %s40_s16 = sshll.u32 %s707_s15, 4  ;;  %p655_p8 = scmp.ne.s32.totalorder %s885_s5, %s654_s19  ;;  %s41_s16 = int_to_ptr.vmem [resolvable:$true] %s40_s16 }
  0x15   :  { %p658_p9 = scmp.lt.u32.totalorder %s654_s19, %s885_s5 }
  0x17   :  { %p660_p10 = pnand %p658_p9, %p655_p8 }
  0x19   :  { %663 = shalt.err (!%p660_p10)
}
  0x1a   :  { %s664_s24 = scalar_lea.vmem %s41_s16, 1024  ;;  %p669_p12 = scmp.lt.s32.totalorder %s41_s16, %s41_s16 }
  0x1b   :  { %p665_p11 = scmp.ne.s32.totalorder %s41_s16, %s664_s24  ;;  %p670_p13 = scmp.lt.s32.totalorder %s664_s24, %s664_s24 }
  0x1d   :  { %p671_p0 = por %p670_p13, %p669_p12 }
  0x1f   :  { %p672_p1 = pnand %p671_p0, %p665_p11 }
  0x21   :  { %675 = shalt.err (!%p672_p1)
}
  0x22   :  { %46 = dma.hbm_to_vmem [thread:$0]  %s885_s5, 1024, %s41_s16, [#allocation6], %s705_s11, %s705_s11, %s706_s12  }
  0x23   :  { %698 = dma.done.wait [#allocation3], 128  }
  0x24   :  { %699 = vsyncadd [#allocation3], 4294967168 }
  0x25   :  { %700 = dma.done.wait [#allocation6], 1024  }
  0x26   :  { %701 = vsyncadd [#allocation6], 4294966272  ;;  %v708_v0 = vmov 0.0   ;;  %vm709_vm0 = vmmov 0   ;;  %v603_v1 = vld [vmem:[#allocation2] sm:$0xff]   ;;  %vm66_vm1 = vcmask 130048   ;;  %v115_v18 = vlaneseq }
  0x27   :  { %529 = vmatprep.subr.bf16.mxu0 %v708_v0  ;;  %531 = vmatprep.mubr.msk.bf16.mxu0 %vm709_vm0, %v708_v0  ;;  %v56_v2 = vld [vmem:[%s880_s0] sm:$0xff]  ;;  %v605_v5 = vld [vmem:[%s883_s3 + $0x8] sm:$0xff]   ;;  %v606_v6 = vld [vmem:[%s883_s3 + $0x10] sm:$0xff]   ;;  %v710_v30 = vmov 0   ;;  %vm456_vm3 = vcmask 64512  }
  0x28   :  { %535 = vmatprep.subr.bf16.mxu1 %v708_v0  ;;  %551 = vmatprep.mubr.msk.bf16.mxu1 %vm709_vm0, %v708_v0  ;;  %v57_v3 = vpack.c.bf16 %v56_v2, %v56_v2  ;;  %v604_v4 = vld [vmem:[%s883_s3] sm:$0xff]   ;;  %v607_v7 = vld [vmem:[%s883_s3 + $0x18] sm:$0xff]   ;;  %v609_v9 = vld [vmem:[%s883_s3 + $0x28] sm:$0xff]   ;;  %v116_v19 = vshrl.u32 %v115_v18, 7  ;;  %v452_v2 = vand.u32 127, %v115_v18 }
  0x29   :  { %530 = vmatpush3.bf16.msra.mxu0 %v603_v1  ;;  %536 = vmatpush3.bf16.msra.mxu1 %v604_v4  ;;  %v608_v8 = vld [vmem:[%s883_s3 + $0x20] sm:$0xff]   ;;  %v610_v10 = vld [vmem:[%s883_s3 + $0x30] sm:$0xff]   ;;  %v611_v11 = vld [vmem:[%s883_s3 + $0x38] sm:$0xff]  }
  0x2a   :  { %555 = vmatprep.subr.bf16.mxu0 %v708_v0  ;;  %537 = vmatprep.subr.bf16.mxu1 %v708_v0  ;;  %v612_v12 = vld [vmem:[#allocation5] sm:$0xff]   ;;  %v613_v13 = vld [vmem:[#allocation5 + $0x8] sm:$0xff]   ;;  %v614_v14 = vld [vmem:[#allocation5 + $0x10] sm:$0xff]   ;;  %v117_v22 = vsub.s32 0, %v116_v19  ;;  %vm453_vm2 = vcmp.eq.s32.totalorder %v452_v2, 1 }
  0x2b   :  { %v615_v15 = vld [vmem:[#allocation5 + $0x18] sm:$0xff]   ;;  %v616_v16 = vld [vmem:[#allocation5 + $0x20] sm:$0xff]   ;;  %v617_v17 = vld [vmem:[#allocation5 + $0x28] sm:$0xff]  }
  0x2c   :  { %532 = vmatmul.mubr.msk.bf16.vlgmr.msra.gmra.mrb[0].mxu0 %vm66_vm1, %v57_v3  ;;  %v111_v20 = vld [vmem:[%s882_s2] sm:$0x1]  ;;  %v618_v32 = vld [vmem:[#allocation5 + $0x30] sm:$0xff]   ;;  %v621_v35 = vld [vmem:[%s886_s6 + $0x8] sm:$0xff]  }
  0x2d   :  { %571 = vmatprep.mubr.msk.bf16.mxu0 %vm709_vm0, %v708_v0  ;;  %538 = vmatpush3.bf16.msra.mxu1 %v605_v5  ;;  %v113_v21 = vpack.i.b16 %v111_v20, %v111_v20  ;;  %v619_v33 = vld [vmem:[#allocation5 + $0x38] sm:$0xff]   ;;  %v622_v36 = vld [vmem:[%s886_s6 + $0x10] sm:$0xff]   ;;  %v623_v37 = vld [vmem:[%s886_s6 + $0x18] sm:$0xff]  }
  0x2e   :  { %539 = vmatprep.subr.bf16.mxu1 %v708_v0  ;;  %556 = vmatpush3.bf16.msra.mxu0 %v612_v12  ;;  %v620_v34 = vld [vmem:[%s886_s6] sm:$0xff]   ;;  %v625_v39 = vld [vmem:[%s886_s6 + $0x28] sm:$0xff]   ;;  %v626_v40 = vld [vmem:[%s886_s6 + $0x30] sm:$0xff]  }
  0x2f   :  { %557 = vmatprep.subr.bf16.mxu0 %v708_v0  ;;  %v118_v23 = vrot.slane %v113_v21, %v117_v22  ;;  %v624_v38 = vld [vmem:[%s886_s6 + $0x20] sm:$0xff]   ;;  %v627_v51 = vld [vmem:[%s886_s6 + $0x38] sm:$0xff]  }
  0x30   :  { %v226_v41 = vld [vmem:[%s884_s4] sm:$0x1]  ;;  %s711_s4 = smov [#allocation7]  }
  0x31   :  { %540 = vmatpush3.bf16.msra.mxu1 %v606_v6  ;;  %v228_v42 = vpack.i.b16 %v226_v41, %v226_v41  ;;  %s464_s6 = sshll.u32 %s711_s4, 4  ;;  %s465_s6 = int_to_ptr.vmem [resolvable:$true] %s464_s6 }
  0x32   :  { %541 = vmatprep.subr.bf16.mxu1 %v708_v0  ;;  %558 = vmatpush3.bf16.msra.mxu0 %v613_v13  ;;  %s676_s11 = scalar_lea.vmem %s465_s6, 128  ;;  %p681_p3 = scmp.lt.s32.totalorder %s465_s6, %s465_s6 }
  0x33   :  { %559 = vmatprep.subr.bf16.mxu0 %v708_v0  ;;  %v233_v43 = vrot.slane %v228_v42, %v117_v22  ;;  %p677_p2 = scmp.ne.s32.totalorder %s465_s6, %s676_s11  ;;  %p682_p4 = scmp.lt.s32.totalorder %s676_s11, %s676_s11 }
  0x35   :  { %542 = vmatpush3.bf16.msra.mxu1 %v607_v7  ;;  %p683_p5 = por %p682_p4, %p681_p3 }
  0x36   :  { %543 = vmatprep.subr.bf16.mxu1 %v708_v0  ;;  %560 = vmatpush3.bf16.msra.mxu0 %v614_v14 }
  0x37   :  { %561 = vmatprep.subr.bf16.mxu0 %v708_v0  ;;  %p684_p6 = pnand %p683_p5, %p677_p2 }
  0x39   :  { %544 = vmatpush3.bf16.msra.mxu1 %v608_v8 }
  0x3a   :  { %545 = vmatprep.subr.bf16.mxu1 %v708_v0  ;;  %562 = vmatpush3.bf16.msra.mxu0 %v615_v15 }
  0x3b   :  { %563 = vmatprep.subr.bf16.mxu0 %v708_v0 }
  0x3d   :  { %546 = vmatpush3.bf16.msra.mxu1 %v609_v9 }
  0x3e   :  { %547 = vmatprep.subr.bf16.mxu1 %v708_v0  ;;  %564 = vmatpush3.bf16.msra.mxu0 %v616_v16 }
  0x3f   :  { %565 = vmatprep.subr.bf16.mxu0 %v708_v0 }
  0x41   :  { %548 = vmatpush3.bf16.msra.mxu1 %v610_v10 }
  0x42   :  { %549 = vmatprep.subr.bf16.mxu1 %v708_v0  ;;  %566 = vmatpush3.bf16.msra.mxu0 %v617_v17 }
  0x43   :  { %567 = vmatprep.subr.bf16.mxu0 %v708_v0 }
  0x45   :  { %550 = vmatpush3.bf16.msra.mxu1 %v611_v11 }
  0x46   :  { %575 = vmatprep.subr.bf16.mxu1 %v708_v0  ;;  %568 = vmatpush3.bf16.msra.mxu0 %v618_v32 }
  0x47   :  { %569 = vmatprep.subr.bf16.mxu0 %v708_v0 }
  0x4a   :  { %570 = vmatpush3.bf16.msra.mxu0 %v619_v33 }
  0xff   :  { %v104_v24 = vpop.f32.mrb[0].mxu0 }
 0x100   :  { %v110_v25 = vpack.c.bf16 %v104_v24, %v104_v24  ;;  %v533_v26 = vpop.f32.mrb[1].mxu0 }
 0x101   :  { %v107_v27 = vpop.f32.mrb[2].mxu0 }
 0x102   :  { %v119_v28 = vadd.bf16 %v118_v23, %v110_v25  ;;  %v534_v29 = vpop.f32.mrb[3].mxu0 }
 0x104   :  { %v120_v31 = vmax.bf16 %v710_v30, %v119_v28 }
 0x106   :  { %552 = vmatmul.mubr.bf16.vlgmr.msra.gmra.mrb[0].mxu1 %v120_v31 }
 0x107   :  { %591 = vmatprep.mubr.msk.bf16.mxu1 %vm709_vm0, %v708_v0  ;;  %576 = vmatpush3.bf16.msra.mxu1 %v620_v34 }
 0x108   :  { %577 = vmatprep.subr.bf16.mxu1 %v708_v0 }
 0x10b   :  { %578 = vmatpush3.bf16.msra.mxu1 %v621_v35 }
 0x10c   :  { %579 = vmatprep.subr.bf16.mxu1 %v708_v0 }
 0x10f   :  { %580 = vmatpush3.bf16.msra.mxu1 %v622_v36 }
 0x110   :  { %581 = vmatprep.subr.bf16.mxu1 %v708_v0 }
 0x113   :  { %582 = vmatpush3.bf16.msra.mxu1 %v623_v37 }
 0x114   :  { %583 = vmatprep.subr.bf16.mxu1 %v708_v0 }
 0x117   :  { %584 = vmatpush3.bf16.msra.mxu1 %v624_v38 }
 0x118   :  { %585 = vmatprep.subr.bf16.mxu1 %v708_v0 }
 0x11b   :  { %586 = vmatpush3.bf16.msra.mxu1 %v625_v39 }
 0x11c   :  { %587 = vmatprep.subr.bf16.mxu1 %v708_v0 }
 0x11f   :  { %588 = vmatpush3.bf16.msra.mxu1 %v626_v40 }
 0x120   :  { %589 = vmatprep.subr.bf16.mxu1 %v708_v0 }
 0x123   :  { %590 = vmatpush3.bf16.msra.mxu1 %v627_v51 }
 0x1d9   :  { %v219_v44 = vpop.f32.mrb[0].mxu1 }
 0x1da   :  { %v225_v45 = vpack.c.bf16 %v219_v44, %v219_v44  ;;  %v553_v46 = vpop.f32.mrb[1].mxu1 }
 0x1db   :  { %v222_v47 = vpop.f32.mrb[2].mxu1 }
 0x1dc   :  { %v234_v48 = vadd.bf16 %v233_v43, %v225_v45  ;;  %v554_v49 = vpop.f32.mrb[3].mxu1 }
 0x1de   :  { %v235_v50 = vmax.bf16 %v710_v30, %v234_v48 }
 0x1e0   :  { %572 = vmatmul.mubr.bf16.vlgmr.msra.gmra.mrb[4].mxu0 %v235_v50 }
 0x2b3   :  { %v334_v52 = vpop.f32.mrb[4].mxu0 }
 0x2b4   :  { %v340_v53 = vpack.c.bf16 %v334_v52, %v334_v52  ;;  %v573_v54 = vpop.f32.mrb[5].mxu0 }
 0x2b5   :  { %v337_v55 = vpop.f32.mrb[6].mxu0 }
 0x2b6   :  { %v341_v56 = vmax.bf16 %v710_v30, %v340_v53  ;;  %v574_v57 = vpop.f32.mrb[7].mxu0 }
 0x2b8   :  { %592 = vmatmul.mubr.bf16.vlgmr.msra.gmra.mrb[4].mxu1 %v341_v56 }
 0x38b   :  { %v440_v58 = vpop.f32.mrb[4].mxu1 }
 0x38c   :  { %v446_v59 = vsub.f32 0.0, %v440_v58  ;;  %v593_v60 = vpop.f32.mrb[5].mxu1 }
 0x38d   :  { %v443_v61 = vpop.f32.mrb[6].mxu1 }
 0x38e   :  { %v447_v62 = vmul.f32 1.442695, %v446_v59  ;;  %v594_v63 = vpop.f32.mrb[7].mxu1 }
 0x390   :  { %628 = vpow2.f32 %v447_v62 }
 0x39a   :  { %v629_v0 = vpop.eup %628 }
 0x39b   :  { %v449_v1 = vadd.f32 1.0, %v629_v0 }
 0x39d   :  { %630 = vrcp.f32 %v449_v1 }
 0x3a7   :  { %v631_v3 = vpop.eup %630 }
 0x3a8   :  { %v454_v4 = vsub.f32 1.0, %v631_v3 }
 0x3aa   :  { %v455_v5 = vsel %vm453_vm2, %v454_v4, %v631_v3 }
 0x3ab   :  { %457 = vst.msk [vmem:[#allocation7] sm:$0xff] %vm456_vm3, %v455_v5 }
 0x3ac   :  { %687 = shalt.err (!%p684_p6)
}
 0x3ad   :  { %s688_s14 = scalar_lea.hbm %s887_s7, 128 }
 0x3ae   :  { %p689_p7 = scmp.ne.s32.totalorder %s887_s7, %s688_s14  ;;  %p692_p8 = scmp.lt.u32.totalorder %s688_s14, %s887_s7 }
 0x3b0   :  { %p694_p9 = pnand %p692_p8, %p689_p7 }
 0x3b2   :  { %697 = shalt.err (!%p694_p9)
}
 0x3b3   :  { %467 = dma.vmem_to_hbm [thread:$0]  %s465_s6, 128, %s887_s7, [#allocation4]  }
 0x3b4   :  { %702 = dma.done.wait [#allocation4], 128  }
 0x3b5   :  { %703 = vsyncadd [#allocation4], 4294967168 }
 0x3b6   :  { %471 = vsyncpa [#allocation3], 1 }
 0x3b7   :  { %472 = vsyncpa [#allocation6], 1 }
 0x3b8   :  { %473 = vsyncpa [#allocation4], 1 }

</bundles_post_ra>
